<compile_context>
chip_gen: v7x
topology: tpu7x:2x2x1
jax: 0.10.0
libtpu: 0.0.40
codegen_flags: <defaults>
</compile_context>

<pallas_src>
import math

import jax
import jax.numpy as jnp
from jax import lax
from jax.experimental import pallas as pl
from jax.experimental.pallas import tpu as pltpu


_SUBLANE = 16   # bf16 sublane pack (also a multiple of the f32 pack of 8)
_LANE = 128


def _bloom_gelu(x):
    # tanh approximation used by bloom_gelu_forward
    return x * 0.5 * (1.0 + jnp.tanh(0.79788456 * x * (1.0 + 0.044715 * x * x)))


def _bloom_mlp_kernel(x_ref, res_ref, w1_ref, b1_ref, w2_ref, b2_ref,
                      out_ref, acc_ref):
    k = pl.program_id(1)

    @pl.when(k == 0)
    def _init():
        acc_ref[...] = jnp.zeros_like(acc_ref)

    # dense_h_to_4h slice: x[tm,H] . W1[tk,H], contracting H (last axis of BOTH
    # operands) -> [tm, tk].  Original weight layout, no transpose anywhere.
    h = lax.dot_general(
        x_ref[...], w1_ref[...],
        dimension_numbers=(((1,), (1,)), ((), ())),
        preferred_element_type=jnp.float32,
    ) + b1_ref[...]
    g = _bloom_gelu(h)

    # dense_4h_to_h slice: g[tm,tk] . W2[H,tk], contracting tk (last axis of both)
    # -> [tm, H], accumulated in f32 VMEM.  The [M,4H] intermediate never hits HBM.
    acc_ref[...] += lax.dot_general(
        g.astype(w2_ref.dtype), w2_ref[...],
        dimension_numbers=(((1,), (1,)), ((), ())),
        preferred_element_type=jnp.float32,
    )

    @pl.when(k == pl.num_programs(1) - 1)
    def _finalize():
        # dense_4h_to_h bias + dropout_add residual (dropout identity at inference)
        out_ref[...] = (acc_ref[...] + b2_ref[...]
                        + res_ref[...].astype(jnp.float32)).astype(out_ref.dtype)


def _round_up(x, m):
    return ((x + m - 1) // m) * m


def _vmem_capacity_bytes():
    try:
        return int(pltpu.get_tpu_info().vmem_capacity_bytes)
    except Exception:
        return 128 * 1024 * 1024


def _pick_tk(F, target):
    """Largest multiple of 128 that divides F and is <= target; else F itself."""
    if F % _LANE != 0:
        return F
    t = min(target, F)
    t -= t % _LANE
    while t >= _LANE:
        if F % t == 0:
            return t
        t -= _LANE
    return F


def _select_tiles(M, H, F, res_bytes, out_bytes, w_bytes, tile_budget, small_vmem):
    """Pick (tm, tk): tm multiple of 16, tk multiple of 128 dividing F (or F)."""
    tm_target = 384 if small_vmem else 512     # v7x roofline ~tm>=310; v5e/v6e like 512
    tk_target = 256 if small_vmem else 512

    tk = _pick_tk(F, tk_target)
    tm = min(tm_target, _round_up(M, _SUBLANE))

    def footprint(tm_, tk_):
        return (2 * tm_ * H * w_bytes          # x tile (compute dtype), double-buffered
                + 2 * tm_ * H * res_bytes      # residual tile
                + 2 * tm_ * H * out_bytes      # output tile
                + 2 * tk_ * H * w_bytes        # W1 row slice
                + 2 * H * tk_ * w_bytes        # W2 column slice
                + 2 * tk_ * 4 + 2 * H * 4      # biases (f32)
                + tm_ * H * 4)                 # resident f32 accumulator

    for _ in range(64):
        if footprint(tm, tk) <= tile_budget:
            break
        shrunk = False
        if tk >= tm and tk > _LANE and F % _LANE == 0:
            new_tk = _pick_tk(F, tk // 2)
            if new_tk < tk:
                tk, shrunk = new_tk, True
        if not shrunk and tm > _SUBLANE:
            tm = max(_SUBLANE, ((tm // 2) // _SUBLANE) * _SUBLANE)
            shrunk = True
        if not shrunk and tk > _LANE and F % _LANE == 0:
            new_tk = _pick_tk(F, tk // 2)
            if new_tk < tk:
                tk, shrunk = new_tk, True
        if not shrunk:
            break

    # On 2-TC parts (v7x), make sure the "parallel" row axis has >=2 blocks so both
    # TensorCores get work even for short sequences.  (1-TC parts skip this so we
    # don't re-stream weights for nothing.)
    if small_vmem:
        Mp = _round_up(M, _SUBLANE)
        if Mp // tm < 2 and Mp >= 2 * _SUBLANE:
            tm = max(_SUBLANE, _round_up((Mp + 1) // 2, _SUBLANE))

    return tm, tk


def bloom_mlp(hidden_states, residual, w1, b1, w2, b2, *, compute_dtype=None):
    """hidden_states, residual: [B,S,H]; w1: [4H,H]; b1: [4H]; w2: [H,4H]; b2: [H]."""
    B, S, H = hidden_states.shape
    F = w1.shape[0]                      # 4 * H
    M = B * S
    out_dtype = hidden_states.dtype

    if compute_dtype is None:
        # bf16 is the native MXU input mode on all current generations; keep f32
        # accumulation in the kernel.  (In a real model, store the weights in bf16
        # so these casts are no-ops / amortized to weight-load time.)
        compute_dtype = (jnp.bfloat16
                         if jnp.dtype(hidden_states.dtype).itemsize >= 4
                         else hidden_states.dtype)

    x2d = hidden_states.reshape(M, H).astype(compute_dtype)
    r2d = residual.reshape(M, H)
    w1c = w1.astype(compute_dtype)       # [F, H] original layout -- no transpose
    w2c = w2.astype(compute_dtype)       # [H, F] original layout -- no transpose
    b1r = b1.reshape(1, F).astype(jnp.float32)
    b2r = b2.reshape(1, H).astype(jnp.float32)

    w_bytes = jnp.dtype(compute_dtype).itemsize
    res_bytes = jnp.dtype(r2d.dtype).itemsize
    out_bytes = jnp.dtype(out_dtype).itemsize

    capacity = _vmem_capacity_bytes()
    small_vmem = capacity <= 64 * 1024 * 1024          # v7x-class VMEM
    vmem_limit = int(capacity * 0.85)                  # leave headroom for compiler scratch
    tile_budget = int(vmem_limit * 0.85)

    tm, tk = _select_tiles(M, H, F, res_bytes, out_bytes, w_bytes,
                           tile_budget, small_vmem)

    # Pad rows so the (parallel) row axis tiles exactly; padded rows are zeros
    # (gelu(b1) contributes garbage only to rows we slice off afterwards).
    Mp = _round_up(M, tm)
    if Mp != M:
        pad = Mp - M
        x2d = jnp.pad(x2d, ((0, pad), (0, 0)))
        r2d = jnp.pad(r2d, ((0, pad), (0, 0)))

    grid = (Mp // tm, F // tk)
    n_row_blocks = grid[0]

    cost = pl.CostEstimate(
        flops=int(4 * M * H * F),                                  # two matmuls
        transcendentals=int(M * F),                                # tanh per intermediate elem
        bytes_accessed=int(
            Mp * H * (w_bytes + res_bytes + out_bytes)             # x + residual + out
            + n_row_blocks * (2 * F * H * w_bytes + (F + H) * 4)   # weights+biases re-streamed
        ),
    )

    # TODO(synk): for very large H (e.g. Bloom-176B H=14336) an output-column tile
    # (tn over H) would shrink the resident accumulator further; here the footprint
    # loop instead shrinks tm/tk, which already fits 64 MiB VMEM.
    out2d = pl.pallas_call(
        _bloom_mlp_kernel,
        out_shape=jax.ShapeDtypeStruct((Mp, H), out_dtype),
        grid_spec=pltpu.PrefetchScalarGridSpec(
            num_scalar_prefetch=0,
            grid=grid,
            in_specs=[
                pl.BlockSpec((tm, H), lambda i, k: (i, 0)),    # x rows (resident across k)
                pl.BlockSpec((tm, H), lambda i, k: (i, 0)),    # residual rows
                pl.BlockSpec((tk, H), lambda i, k: (k, 0)),    # W1 row slice   ([4H, H])
                pl.BlockSpec((1, tk), lambda i, k: (0, k)),    # b1 slice
                pl.BlockSpec((H, tk), lambda i, k: (0, k)),    # W2 column slice ([H, 4H])
                pl.BlockSpec((1, H), lambda i, k: (0, 0)),     # b2
            ],
            out_specs=pl.BlockSpec((tm, H), lambda i, k: (i, 0)),
            scratch_shapes=[pltpu.VMEM((tm, H), jnp.float32)],
        ),
        compiler_params=pltpu.CompilerParams(
            dimension_semantics=("parallel", "arbitrary"),
            vmem_limit_bytes=vmem_limit,
        ),
        cost_estimate=cost,
    )(x2d, r2d, w1c, b1r, w2c, b2r)

    if Mp != M:
        out2d = out2d[:M]
    return out2d.reshape(B, S, H)


def bloom_mlp_ref(hidden_states, residual, w1, b1, w2, b2):
    """Pure-JAX reference mirroring the PyTorch BloomMLP forward (eval mode)."""
    h = hidden_states @ w1.T + b1
    g = h * 0.5 * (1.0 + jnp.tanh(0.79788456 * h * (1.0 + 0.044715 * h * h)))
    inter = g @ w2.T + b2
    return inter + residual              # dropout_add with training=False


if __name__ == "__main__":
    # Small config consistent with BloomMLP: hidden_size H, intermediate 4H.
    B, S, H = 2, 8, 32
    F = 4 * H

    key = jax.random.PRNGKey(0)
    ks = jax.random.split(key, 6)

    def uinit(k, shape, fan_in):
        bound = 1.0 / math.sqrt(fan_in)
        return jax.random.uniform(k, shape, jnp.float32, -bound, bound)

    hidden_states = jax.random.normal(ks[0], (B, S, H), jnp.float32)
    residual = jax.random.normal(ks[1], (B, S, H), jnp.float32)

    # PyTorch nn.Linear default-style init (deterministic).
    w1 = uinit(ks[2], (F, H), H)         # dense_h_to_4h.weight  [4H, H]
    b1 = uinit(ks[3], (F,), H)           # dense_h_to_4h.bias
    w2 = uinit(ks[4], (H, F), F)         # dense_4h_to_h.weight  [H, 4H]
    b2 = uinit(ks[5], (H,), F)           # dense_4h_to_h.bias

    out = jax.block_until_ready(bloom_mlp(hidden_states, residual, w1, b1, w2, b2))
    ref = jax.block_until_ready(bloom_mlp_ref(hidden_states, residual, w1, b1, w2, b2))

    assert out.shape == (B, S, H)
    assert out.dtype == hidden_states.dtype
    # bf16 MXU operands with f32 accumulation vs. an f32 reference.
    assert jnp.allclose(out, ref, atol=2e-2, rtol=2e-2), "mismatch vs reference"
    print("KERNEL_OK")
</pallas_src>

<mosaic_0001>
module attributes {stable_mosaic.version = 11 : i64} {
  func.func @_bloom_mlp_kernel(%arg0: i32, %arg1: i32, %arg2: memref<16x32xbf16, #tpu.memory_space<vmem>>, %arg3: memref<16x32xf32, #tpu.memory_space<vmem>>, %arg4: memref<128x32xbf16, #tpu.memory_space<vmem>>, %arg5: memref<1x128xf32, #tpu.memory_space<vmem>>, %arg6: memref<32x128xbf16, #tpu.memory_space<vmem>>, %arg7: memref<1x32xf32, #tpu.memory_space<vmem>>, %arg8: memref<16x32xf32, #tpu.memory_space<vmem>>, %arg9: memref<16x32xf32, #tpu.memory_space<vmem>>) attributes {dimension_semantics = [#tpu.dimension_semantics<parallel>, #tpu.dimension_semantics<arbitrary>], iteration_bounds = array<i64: 1, 1>, scalar_prefetch = 0 : i64, scratch_operands = 1 : i64, tpu.core_type = #tpu.core_type<tc>, window_params = [{transform_indices = @transform_0, window_bounds = array<i64: 16, 32>}, {transform_indices = @transform_1, window_bounds = array<i64: 16, 32>}, {transform_indices = @transform_2, window_bounds = array<i64: 128, 32>}, {transform_indices = @transform_3, window_bounds = array<i64: 1, 128>}, {transform_indices = @transform_4, window_bounds = array<i64: 32, 128>}, {pipeline_mode = #tpu.pipeline_mode<synchronous>, transform_indices = @transform_5, window_bounds = array<i64: 1, 32>}, {transform_indices = @transform_6, window_bounds = array<i64: 16, 32>}]} {
    %c0_i32 = arith.constant 0 : i32
    %0 = arith.cmpi eq, %arg1, %c0_i32 : i32
    %1 = arith.extui %0 : i1 to i32
    %c0_i32_0 = arith.constant 0 : i32
    %2 = arith.cmpi ne, %1, %c0_i32_0 : i32
    scf.if %2 {
      %cst_20 = arith.constant 0.000000e+00 : f32
      %32 = vector.broadcast %cst_20 : f32 to vector<16x32xf32>
      %c0_21 = arith.constant 0 : index
      %c0_22 = arith.constant 0 : index
      %33 = vector.load %arg9[%c0_21, %c0_22] : memref<16x32xf32, #tpu.memory_space<vmem>>, vector<16x32xf32>
      tpu.vector_store %arg9[%c0_21, %c0_22], %32 {strides = array<i32>} : memref<16x32xf32, #tpu.memory_space<vmem>>, vector<16x32xf32>,
    } else {
    }
    %c0 = arith.constant 0 : index
    %c0_1 = arith.constant 0 : index
    %3 = vector.load %arg2[%c0, %c0_1] : memref<16x32xbf16, #tpu.memory_space<vmem>>, vector<16x32xbf16>
    %c0_2 = arith.constant 0 : index
    %c0_3 = arith.constant 0 : index
    %4 = vector.load %arg4[%c0_2, %c0_3] : memref<128x32xbf16, #tpu.memory_space<vmem>>, vector<128x32xbf16>
    %cst = arith.constant dense<0.000000e+00> : vector<16x128xf32>
    %5 = tpu.matmul %3, %4, %cst {dimension_numbers = #tpu.dot_dimension_numbers<[1], [1], [0], [0], [0, 0, 1, 0], [], []>} : vector<16x32xbf16>, vector<128x32xbf16>, vector<16x128xf32> -> vector<16x128xf32>
    %c0_4 = arith.constant 0 : index
    %c0_5 = arith.constant 0 : index
    %6 = vector.load %arg5[%c0_4, %c0_5] : memref<1x128xf32, #tpu.memory_space<vmem>>, vector<1x128xf32>
    %7 = vector.broadcast %6 : vector<1x128xf32> to vector<16x128xf32>
    %8 = arith.addf %5, %7 : vector<16x128xf32>
    %cst_6 = arith.constant 5.000000e-01 : f32
    %9 = vector.broadcast %cst_6 : f32 to vector<16x128xf32>
    %10 = arith.mulf %8, %9 : vector<16x128xf32>
    %cst_7 = arith.constant 0.797884583 : f32
    %11 = vector.broadcast %cst_7 : f32 to vector<16x128xf32>
    %12 = arith.mulf %11, %8 : vector<16x128xf32>
    %cst_8 = arith.constant 4.471500e-02 : f32
    %13 = vector.broadcast %cst_8 : f32 to vector<16x128xf32>
    %14 = arith.mulf %13, %8 : vector<16x128xf32>
    %15 = arith.mulf %14, %8 : vector<16x128xf32>
    %cst_9 = arith.constant 1.000000e+00 : f32
    %16 = vector.broadcast %cst_9 : f32 to vector<16x128xf32>
    %17 = arith.addf %16, %15 : vector<16x128xf32>
    %18 = arith.mulf %12, %17 : vector<16x128xf32>
    %19 = math.tanh %18 : vector<16x128xf32>
    %cst_10 = arith.constant 1.000000e+00 : f32
    %20 = vector.broadcast %cst_10 : f32 to vector<16x128xf32>
    %21 = arith.addf %20, %19 : vector<16x128xf32>
    %22 = arith.mulf %10, %21 : vector<16x128xf32>
    %c0_11 = arith.constant 0 : index
    %c0_12 = arith.constant 0 : index
    %23 = vector.load %arg9[%c0_11, %c0_12] : memref<16x32xf32, #tpu.memory_space<vmem>>, vector<16x32xf32>
    %24 = arith.truncf %22 : vector<16x128xf32> to vector<16x128xbf16>
    %c0_13 = arith.constant 0 : index
    %c0_14 = arith.constant 0 : index
    %25 = vector.load %arg6[%c0_13, %c0_14] : memref<32x128xbf16, #tpu.memory_space<vmem>>, vector<32x128xbf16>
    %cst_15 = arith.constant dense<0.000000e+00> : vector<16x32xf32>
    %26 = tpu.matmul %24, %25, %cst_15 {dimension_numbers = #tpu.dot_dimension_numbers<[1], [1], [0], [0], [0, 0, 1, 0], [], []>} : vector<16x128xbf16>, vector<32x128xbf16>, vector<16x32xf32> -> vector<16x32xf32>
    %27 = arith.addf %23, %26 : vector<16x32xf32>
    %c0_16 = arith.constant 0 : index
    %c0_17 = arith.constant 0 : index
    %28 = vector.load %arg9[%c0_16, %c0_17] : memref<16x32xf32, #tpu.memory_space<vmem>>, vector<16x32xf32>
    tpu.vector_store %arg9[%c0_16, %c0_17], %27 {strides = array<i32>} : memref<16x32xf32, #tpu.memory_space<vmem>>, vector<16x32xf32>,
    %c0_i32_18 = arith.constant 0 : i32
    %29 = arith.cmpi eq, %arg1, %c0_i32_18 : i32
    %30 = arith.extui %29 : i1 to i32
    %c0_i32_19 = arith.constant 0 : i32
    %31 = arith.cmpi ne, %30, %c0_i32_19 : i32
    scf.if %31 {
      %c0_20 = arith.constant 0 : index
      %c0_21 = arith.constant 0 : index
      %32 = vector.load %arg9[%c0_20, %c0_21] : memref<16x32xf32, #tpu.memory_space<vmem>>, vector<16x32xf32>
      %c0_22 = arith.constant 0 : index
      %c0_23 = arith.constant 0 : index
      %33 = vector.load %arg7[%c0_22, %c0_23] : memref<1x32xf32, #tpu.memory_space<vmem>>, vector<1x32xf32>
      %34 = vector.broadcast %33 : vector<1x32xf32> to vector<16x32xf32>
      %35 = arith.addf %32, %34 : vector<16x32xf32>
      %c0_24 = arith.constant 0 : index
      %c0_25 = arith.constant 0 : index
      %36 = vector.load %arg3[%c0_24, %c0_25] : memref<16x32xf32, #tpu.memory_space<vmem>>, vector<16x32xf32>
      %37 = arith.addf %35, %36 : vector<16x32xf32>
      %c0_26 = arith.constant 0 : index
      %c0_27 = arith.constant 0 : index
      %38 = vector.load %arg8[%c0_26, %c0_27] : memref<16x32xf32, #tpu.memory_space<vmem>>, vector<16x32xf32>
      tpu.vector_store %arg8[%c0_26, %c0_27], %37 {strides = array<i32>} : memref<16x32xf32, #tpu.memory_space<vmem>>, vector<16x32xf32>,
    } else {
    }
    return
  }
  func.func @transform_0(%arg0: i32, %arg1: i32) -> (i32, i32) {
    %c0_i32 = arith.constant 0 : i32
    %c0_i32_0 = arith.constant 0 : i32
    return %arg0, %c0_i32 : i32, i32
  }
  func.func @transform_1(%arg0: i32, %arg1: i32) -> (i32, i32) {
    %c0_i32 = arith.constant 0 : i32
    %c0_i32_0 = arith.constant 0 : i32
    return %arg0, %c0_i32 : i32, i32
  }
  func.func @transform_2(%arg0: i32, %arg1: i32) -> (i32, i32) {
    %c0_i32 = arith.constant 0 : i32
    %c0_i32_0 = arith.constant 0 : i32
    return %arg1, %c0_i32 : i32, i32
  }
  func.func @transform_3(%arg0: i32, %arg1: i32) -> (i32, i32) {
    %c0_i32 = arith.constant 0 : i32
    %c0_i32_0 = arith.constant 0 : i32
    return %c0_i32, %arg1 : i32, i32
  }
  func.func @transform_4(%arg0: i32, %arg1: i32) -> (i32, i32) {
    %c0_i32 = arith.constant 0 : i32
    %c0_i32_0 = arith.constant 0 : i32
    return %c0_i32, %arg1 : i32, i32
  }
  func.func @transform_5(%arg0: i32, %arg1: i32) -> (i32, i32) {
    %c0_i32 = arith.constant 0 : i32
    %c0_i32_0 = arith.constant 0 : i32
    %c0_i32_1 = arith.constant 0 : i32
    return %c0_i32, %c0_i32_0 : i32, i32
  }
  func.func @transform_6(%arg0: i32, %arg1: i32) -> (i32, i32) {
    %c0_i32 = arith.constant 0 : i32
    %c0_i32_0 = arith.constant 0 : i32
    return %arg0, %c0_i32 : i32, i32
  }
}

</mosaic_0001>

<bundles_post_ra>
// kernel: tpu_custom_call.1
= control target key start
LH: loop header
LB: loop body
LE: loop exit
PB: predicated region body
PF: predicated region fallthrough
CT: control target
= control target key end

     0   :  { %11 = vsyncpa [#allocation4], 0  ;;  %s779_s0 = inlined_call_operand.hbm [shape: bf16[16,32], index: 0, kind: input, shape index: {}]   ;;  %s780_s1 = inlined_call_operand.hbm [shape: f32[16,32], index: 1, kind: input, shape index: {}]   ;;  %s781_s2 = inlined_call_operand.hbm [shape: bf16[128,32], index: 2, kind: input, shape index: {}]   ;;  %s782_s3 = inlined_call_operand.hbm [shape: f32[1,128], index: 3, kind: input, shape index: {}]   ;;  %s783_s4 = inlined_call_operand.hbm [shape: bf16[32,128], index: 4, kind: input, shape index: {}]   ;;  %s784_s5 = inlined_call_operand.hbm [shape: f32[1,32], index: 5, kind: input, shape index: {}]   ;;  %s785_s6 = inlined_call_operand.hbm [shape: f32[16,32], index: 6, kind: output, shape index: {}]  }
   0x1   :  { %12 = vsyncpa [#allocation7], 0 }
   0x2   :  { %13 = vsyncpa [#allocation10], 0 }
   0x3   :  { %14 = vsyncpa [#allocation13], 0 }
   0x4   :  { %15 = vsyncpa [#allocation5], 0  ;;  %s617_s21 = smov [#allocation6]   ;;  %s453_s25 = scalar_lea.hbm %s780_s1, 256 }
   0x5   :  { %s33_s22 = sshll.u32 %s617_s21, 4  ;;  %p454_p0 = scmp.ne.s32.totalorder %s780_s1, %s453_s25  ;;  %s34_s22 = int_to_ptr.vmem [resolvable:$true] %s33_s22 }
   0x6   :  { %p457_p1 = scmp.lt.u32.totalorder %s453_s25, %s780_s1 }
   0x8   :  { %p459_p2 = pnand %p457_p1, %p454_p0 }
   0xa   :  { %462 = shalt.err (!%p459_p2)
}
   0xb   :  { %s463_s30 = scalar_lea.vmem %s34_s22, 256  ;;  %p468_p4 = scmp.lt.s32.totalorder %s34_s22, %s34_s22 }
   0xc   :  { %p464_p3 = scmp.ne.s32.totalorder %s34_s22, %s463_s30  ;;  %p469_p5 = scmp.lt.s32.totalorder %s463_s30, %s463_s30 }
   0xe   :  { %p470_p6 = por %p469_p5, %p468_p4 }
  0x10   :  { %p471_p7 = pnand %p470_p6, %p464_p3 }
  0x12   :  { %474 = shalt.err (!%p471_p7)
}
  0x13   :  { %s618_s7 = smov 128   ;;  %s619_s8 = smov 8  }
  0x14   :  { %39 = dma.hbm_to_vmem [thread:$0]  %s780_s1, 256, %s34_s22, [#allocation7], %s618_s7, %s618_s7, %s619_s8  }
  0x15   :  { %s620_s11 = smov [#allocation9]   ;;  %s621_s13 = smov [#allocation3]  }
  0x16   :  { %s58_s12 = sshll.u32 %s620_s11, 4  ;;  %s21_s14 = sshll.u32 %s621_s13, 4  ;;  %s59_s12 = int_to_ptr.vmem [resolvable:$true] %s58_s12  ;;  %s22_s14 = int_to_ptr.vmem [resolvable:$true] %s21_s14 }
  0x17   :  { %s475_s17 = scalar_lea.hbm %s782_s3, 16 }
  0x18   :  { %p476_p8 = scmp.ne.s32.totalorder %s782_s3, %s475_s17  ;;  %p479_p9 = scmp.lt.u32.totalorder %s475_s17, %s782_s3 }
  0x1a   :  { %p481_p10 = pnand %p479_p9, %p476_p8 }
  0x1c   :  { %484 = shalt.err (!%p481_p10)
}
  0x1d   :  { %s485_s1 = scalar_lea.vmem %s59_s12, 16  ;;  %s489_s22 = scalar_lea.vmem %s59_s12, 32 }
  0x1e   :  { %p486_p11 = scmp.ne.s32.totalorder %s59_s12, %s485_s1  ;;  %p490_p12 = scmp.lt.s32.totalorder %s59_s12, %s59_s12 }
  0x1f   :  { %p491_p13 = scmp.lt.s32.totalorder %s489_s22, %s485_s1 }
  0x21   :  { %p492_p0 = por %p491_p13, %p490_p12 }
  0x23   :  { %p493_p1 = pnand %p492_p0, %p486_p11 }
  0x25   :  { %496 = shalt.err (!%p493_p1)
}
  0x26   :  { %61 = dma.hbm_to_vmem [thread:$0]  %s782_s3, 16, %s59_s12, [#allocation10]  }
  0x27   :  { %s497_s27 = scalar_lea.hbm %s779_s0, 128 }
  0x28   :  { %p498_p2 = scmp.ne.s32.totalorder %s779_s0, %s497_s27  ;;  %p501_p3 = scmp.lt.u32.totalorder %s497_s27, %s779_s0 }
  0x2a   :  { %p503_p4 = pnand %p501_p3, %p498_p2 }
  0x2c   :  { %506 = shalt.err (!%p503_p4)
}
  0x2d   :  { %s507_s10 = scalar_lea.vmem %s22_s14, 128  ;;  %p512_p6 = scmp.lt.s32.totalorder %s22_s14, %s22_s14 }
  0x2e   :  { %p508_p5 = scmp.ne.s32.totalorder %s22_s14, %s507_s10  ;;  %p513_p7 = scmp.lt.s32.totalorder %s507_s10, %s507_s10 }
  0x30   :  { %p514_p8 = por %p513_p7, %p512_p6 }
  0x32   :  { %p515_p9 = pnand %p514_p8, %p508_p5 }
  0x34   :  { %518 = shalt.err (!%p515_p9)
}
  0x35   :  { %s622_s3 = smov 64   ;;  %s623_s11 = smov 4  }
  0x36   :  { %27 = dma.hbm_to_vmem [thread:$0]  %s779_s0, 128, %s22_s14, [#allocation4], %s622_s3, %s622_s3, %s623_s11  }
  0x37   :  { %s624_s15 = smov [#allocation8]   ;;  %s625_s17 = smov [#allocation11]  }
  0x38   :  { %s45_s16 = sshll.u32 %s624_s15, 4  ;;  %s67_s18 = sshll.u32 %s625_s17, 4  ;;  %s46_s16 = int_to_ptr.vmem [resolvable:$true] %s45_s16  ;;  %s68_s18 = int_to_ptr.vmem [resolvable:$true] %s67_s18 }
  0x39   :  { %s519_s21 = scalar_lea.hbm %s781_s2, 1024 }
  0x3a   :  { %p520_p10 = scmp.ne.s32.totalorder %s781_s2, %s519_s21  ;;  %p523_p11 = scmp.lt.u32.totalorder %s519_s21, %s781_s2 }
  0x3c   :  { %p525_p12 = pnand %p523_p11, %p520_p10 }
  0x3e   :  { %528 = shalt.err (!%p525_p12)
}
  0x3f   :  { %s529_s0 = scalar_lea.vmem %s46_s16, 1024  ;;  %p534_p0 = scmp.lt.s32.totalorder %s46_s16, %s46_s16 }
  0x40   :  { %p530_p13 = scmp.ne.s32.totalorder %s46_s16, %s529_s0  ;;  %p535_p1 = scmp.lt.s32.totalorder %s529_s0, %s529_s0 }
  0x42   :  { %p536_p2 = por %p535_p1, %p534_p0 }
  0x44   :  { %p537_p3 = pnand %p536_p2, %p530_p13 }
  0x46   :  { %540 = shalt.err (!%p537_p3)
}
  0x47   :  { %51 = dma.hbm_to_vmem [thread:$0]  %s781_s2, 1024, %s46_s16, [#allocation7], %s622_s3, %s622_s3, %s623_s11  }
  0x48   :  { %s541_s28 = scalar_lea.hbm %s783_s4, 256 }
  0x49   :  { %p542_p4 = scmp.ne.s32.totalorder %s783_s4, %s541_s28  ;;  %p545_p5 = scmp.lt.u32.totalorder %s541_s28, %s783_s4 }
  0x4b   :  { %p547_p6 = pnand %p545_p5, %p542_p4 }
  0x4d   :  { %550 = shalt.err (!%p547_p6)
}
  0x4e   :  { %s551_s12 = scalar_lea.vmem %s68_s18, 256  ;;  %p556_p8 = scmp.lt.s32.totalorder %s68_s18, %s68_s18 }
  0x4f   :  { %p552_p7 = scmp.ne.s32.totalorder %s68_s18, %s551_s12  ;;  %p557_p9 = scmp.lt.s32.totalorder %s551_s12, %s551_s12 }
  0x51   :  { %p558_p10 = por %p557_p9, %p556_p8 }
  0x53   :  { %p559_p11 = pnand %p558_p10, %p552_p7 }
  0x55   :  { %562 = shalt.err (!%p559_p11)
}
  0x56   :  { %73 = dma.hbm_to_vmem [thread:$0]  %s783_s4, 256, %s68_s18, [#allocation10], %s622_s3, %s622_s3, %s623_s11  }
  0x57   :  { %s626_s15 = smov [#allocation12]   ;;  %s563_s20 = scalar_lea.hbm %s784_s5, 16 }
  0x58   :  { %s80_s16 = sshll.u32 %s626_s15, 4  ;;  %p564_p12 = scmp.ne.s32.totalorder %s784_s5, %s563_s20  ;;  %s81_s16 = int_to_ptr.vmem [resolvable:$true] %s80_s16 }
  0x59   :  { %p567_p13 = scmp.lt.u32.totalorder %s563_s20, %s784_s5 }
  0x5b   :  { %p569_p0 = pnand %p567_p13, %p564_p12 }
  0x5d   :  { %572 = shalt.err (!%p569_p0)
}
  0x5e   :  { %s573_s24 = scalar_lea.vmem %s81_s16, 16  ;;  %s577_s4 = scalar_lea.vmem %s81_s16, 32 }
  0x5f   :  { %p574_p1 = scmp.ne.s32.totalorder %s81_s16, %s573_s24  ;;  %p578_p2 = scmp.lt.s32.totalorder %s81_s16, %s81_s16 }
  0x60   :  { %p579_p3 = scmp.lt.s32.totalorder %s577_s4, %s573_s24 }
  0x62   :  { %p580_p4 = por %p579_p3, %p578_p2 }
  0x64   :  { %p581_p5 = pnand %p580_p4, %p574_p1 }
  0x66   :  { %584 = shalt.err (!%p581_p5)
}
  0x67   :  { %83 = dma.hbm_to_vmem [thread:$0]  %s784_s5, 16, %s81_s16, [#allocation13]  }
  0x68   :  { %607 = dma.done.wait [#allocation4], 128  }
  0x69   :  { %608 = vsyncadd [#allocation4], 4294967168 }
  0x6a   :  { %609 = dma.done.wait [#allocation7], 1280  }
  0x6b   :  { %610 = vsyncadd [#allocation7], 4294966016 }
  0x6c   :  { %611 = dma.done.wait [#allocation10], 272  }
  0x6d   :  { %612 = vsyncadd [#allocation10], 4294967024 }
  0x6e   :  { %613 = dma.done.wait [#allocation13], 16  }
  0x6f   :  { %614 = vsyncadd [#allocation13], 4294967280  ;;  %vm107_vm0 = vcmask 261120   ;;  %v627_v0 = vmov 0.0   ;;  %vm628_vm1 = vmmov 0   ;;  %v438_v1 = vld [vmem:[#allocation8] sm:$0xff]  }
  0x70   :  { %397 = vmatprep.subr.bf16.mxu0 %v627_v0  ;;  %108 = vst.msk [vmem:[#allocation2] sm:$0xff] %vm107_vm0, %v627_v0  ;;  %109 = vst.msk [vmem:[#allocation2 + $0x8] sm:$0xff] %vm107_vm0, %v627_v0  ;;  %413 = vmatprep.mubr.msk.bf16.mxu0 %vm628_vm1, %v627_v0  ;;  %v185_v2 = vsel %vm107_vm0, %v438_v1, 0  ;;  %v439_v3 = vld [vmem:[#allocation8 + $0x8] sm:$0xff]   ;;  %v440_v5 = vld [vmem:[#allocation8 + $0x10] sm:$0xff]   ;;  %s629_s5 = smov [#allocation14]  }
  0x71   :  { %417 = vmatprep.subr.bf16.mxu1 %v627_v0  ;;  %421 = vmatprep.mubr.msk.bf16.mxu1 %vm628_vm1, %v627_v0  ;;  %v188_v4 = vsel %vm107_vm0, %v439_v3, 0  ;;  %v191_v6 = vsel %vm107_vm0, %v440_v5, 0  ;;  %v441_v7 = vld [vmem:[#allocation8 + $0x18] sm:$0xff]   ;;  %v442_v9 = vld [vmem:[#allocation8 + $0x20] sm:$0xff]   ;;  %v443_v11 = vld [vmem:[#allocation8 + $0x28] sm:$0xff]   ;;  %s356_s18 = sshll.u32 %s629_s5, 4  ;;  %s357_s18 = int_to_ptr.vmem [resolvable:$true] %s356_s18 }
  0x72   :  { %398 = vmatpush3.bf16.xpose.msra.mxu0 %v185_v2  ;;  %v194_v8 = vsel %vm107_vm0, %v441_v7, 0  ;;  %v197_v10 = vsel %vm107_vm0, %v442_v9, 0  ;;  %v200_v12 = vsel %vm107_vm0, %v443_v11, 0  ;;  %v444_v13 = vld [vmem:[#allocation8 + $0x30] sm:$0xff]   ;;  %v445_v15 = vld [vmem:[#allocation8 + $0x38] sm:$0xff]   ;;  %v446_v17 = vld [vmem:[#allocation3] sm:$0xff]   ;;  %p590_p7 = scmp.lt.s32.totalorder %s357_s18, %s357_s18 }
  0x73   :  { %399 = vmatprep.subr.bf16.mxu0 %v627_v0  ;;  %v203_v14 = vsel %vm107_vm0, %v444_v13, 0  ;;  %v206_v16 = vsel %vm107_vm0, %v445_v15, 0  ;;  %v447_v18 = vld [vmem:[#allocation11] sm:$0xff]   ;;  %v448_v19 = vld [vmem:[#allocation11 + $0x8] sm:$0xff]   ;;  %v371_v20 = vld [vmem:[#allocation9] ss:$0 sm:$0xff] }
  0x74   :  { %418 = vmatpush3.bf16.xpose.msra.mxu1 %v447_v18  ;;  %v384_v54 = vld [vmem:[#allocation12] ss:$0 sm:$0xff]  ;;  %v346_v59 = vld [vmem:[#allocation6 + $0x8] sm:$0xff]  ;;  %s585_s0 = scalar_lea.vmem %s357_s18, 256 }
  0x75   :  { %419 = vmatprep.subr.bf16.mxu1 %v627_v0  ;;  %v345_v56 = vld [vmem:[#allocation6] sm:$0xff]  ;;  %p586_p6 = scmp.ne.s32.totalorder %s357_s18, %s585_s0  ;;  %p591_p8 = scmp.lt.s32.totalorder %s585_s0, %s585_s0 }
  0x77   :  { %v267_v46 = vld [vmem:[#allocation2] sm:$0xff]  ;;  %v268_v48 = vld [vmem:[#allocation2 + $0x8] sm:$0xff]  ;;  %p592_p9 = por %p591_p8, %p590_p7 }
  0x79   :  { %p593_p10 = pnand %p592_p9, %p586_p6 }
  0x7a   :  { %400 = vmatpush3.bf16.xpose.msra.mxu0 %v188_v4 }
  0x7b   :  { %401 = vmatprep.subr.bf16.mxu0 %v627_v0 }
  0x7c   :  { %420 = vmatpush3.bf16.xpose.msra.mxu1 %v448_v19 }
  0x82   :  { %402 = vmatpush3.bf16.xpose.msra.mxu0 %v191_v6 }
  0x83   :  { %403 = vmatprep.subr.bf16.mxu0 %v627_v0 }
  0x8a   :  { %404 = vmatpush3.bf16.xpose.msra.mxu0 %v194_v8 }
  0x8b   :  { %405 = vmatprep.subr.bf16.mxu0 %v627_v0 }
  0x92   :  { %406 = vmatpush3.bf16.xpose.msra.mxu0 %v197_v10 }
  0x93   :  { %407 = vmatprep.subr.bf16.mxu0 %v627_v0 }
  0x9a   :  { %408 = vmatpush3.bf16.xpose.msra.mxu0 %v200_v12 }
  0x9b   :  { %409 = vmatprep.subr.bf16.mxu0 %v627_v0 }
  0xa2   :  { %410 = vmatpush3.bf16.xpose.msra.mxu0 %v203_v14 }
  0xa3   :  { %411 = vmatprep.subr.bf16.mxu0 %v627_v0 }
  0xaa   :  { %412 = vmatpush3.bf16.xpose.msra.mxu0 %v206_v16 }
  0xb1   :  { %414 = vmatmul.mubr.msk.bf16.vlgmr.msra.gmra.mrb[0].mxu0 %vm107_vm0, %v446_v17 }
 0x184   :  { %v242_v21 = vpop.f32.mrb[0].mxu0 }
 0x185   :  { %v243_v22 = vadd.f32 %v371_v20, %v242_v21  ;;  %v415_v23 = vpop.f32.mrb[1].mxu0 }
 0x186   :  { %v245_v24 = vpop.f32.mrb[2].mxu0 }
 0x187   :  { %v253_v25 = vmul.f32 0.044715, %v243_v22  ;;  %v246_v26 = vadd.f32 %v371_v20, %v245_v24  ;;  %v416_v27 = vpop.f32.mrb[3].mxu0  ;;  %v251_v30 = vmul.f32 0.7978846, %v243_v22  ;;  %v249_v40 = vmul.f32 0.5, %v243_v22 }
 0x189   :  { %v255_v28 = vmul.f32 %v253_v25, %v243_v22  ;;  %v254_v29 = vmul.f32 0.044715, %v246_v26  ;;  %v252_v34 = vmul.f32 0.7978846, %v246_v26  ;;  %v250_v41 = vmul.f32 0.5, %v246_v26 }
 0x18b   :  { %v257_v31 = vadd.f32 1.0, %v255_v28  ;;  %v256_v32 = vmul.f32 %v254_v29, %v246_v26 }
 0x18d   :  { %v259_v33 = vmul.f32 %v257_v31, %v251_v30  ;;  %v258_v35 = vadd.f32 1.0, %v256_v32 }
 0x18f   :  { %v260_v36 = vmul.f32 %v258_v35, %v252_v34  ;;  %449 = vtanh.f32 %v259_v33 }
 0x191   :  { %451 = vtanh.f32 %v260_v36 }
 0x199   :  { %v450_v37 = vpop.eup %449 }
 0x19a   :  { %v263_v38 = vadd.f32 1.0, %v450_v37 }
 0x19b   :  { %v452_v39 = vpop.eup %451 }
 0x19c   :  { %v264_v42 = vadd.f32 1.0, %v452_v39  ;;  %v265_v43 = vmul.f32 %v263_v38, %v249_v40 }
 0x19e   :  { %v266_v44 = vmul.f32 %v264_v42, %v250_v41 }
 0x1a0   :  { %v269_v45 = vpack.c.bf16 %v266_v44, %v265_v43 }
 0x1a2   :  { %422 = vmatmul.mubr.bf16.vlgmr.msra.gmra.mrb[0].mxu1 %v269_v45 }
 0x275   :  { %v320_v47 = vpop.f32.mrb[0].mxu1 }
 0x276   :  { %v327_v49 = vadd.f32 %v320_v47, %v267_v46  ;;  %v423_v50 = vpop.f32.mrb[1].mxu1 }
 0x277   :  { %v323_v51 = vpop.f32.mrb[2].mxu1 }
 0x278   :  { %329 = vst.msk [vmem:[#allocation2] sm:$0xff] %vm107_vm0, %v327_v49  ;;  %v328_v52 = vadd.f32 %v323_v51, %v268_v48  ;;  %v424_v53 = vpop.f32.mrb[3].mxu1 }
 0x27a   :  { %330 = vst.msk [vmem:[#allocation2 + $0x8] sm:$0xff] %vm107_vm0, %v328_v52 }
 0x27f   :  { %v334_v55 = vld [vmem:[#allocation2] sm:$0xff] }
 0x280   :  { %v343_v57 = vadd.f32 %v384_v54, %v334_v55 }
 0x281   :  { %v335_v58 = vld [vmem:[#allocation2 + $0x8] sm:$0xff] }
 0x282   :  { %v344_v60 = vadd.f32 %v384_v54, %v335_v58  ;;  %v347_v61 = vadd.f32 %v345_v56, %v343_v57 }
 0x284   :  { %v348_v62 = vadd.f32 %v346_v59, %v344_v60  ;;  %349 = vst.msk [vmem:[#allocation14] sm:$0xff] %vm107_vm0, %v347_v61 }
 0x286   :  { %350 = vst.msk [vmem:[#allocation14 + $0x8] sm:$0xff] %vm107_vm0, %v348_v62 }
 0x287   :  { %596 = shalt.err (!%p593_p10)
}
 0x288   :  { %s597_s26 = scalar_lea.hbm %s785_s6, 256 }
 0x289   :  { %p598_p11 = scmp.ne.s32.totalorder %s785_s6, %s597_s26  ;;  %p601_p12 = scmp.lt.u32.totalorder %s597_s26, %s785_s6 }
 0x28b   :  { %p603_p13 = pnand %p601_p12, %p598_p11 }
 0x28d   :  { %606 = shalt.err (!%p603_p13)
}
 0x28e   :  { %362 = dma.vmem_to_hbm [thread:$0]  %s357_s18, 256, %s785_s6, [#allocation5], %s618_s7, %s618_s7, %s619_s8  }
 0x28f   :  { %615 = dma.done.wait [#allocation5], 256  }
 0x290   :  { %616 = vsyncadd [#allocation5], 4294967040 }
 0x291   :  { %366 = vsyncpa [#allocation4], 1 }
 0x292   :  { %367 = vsyncpa [#allocation7], 1 }
 0x293   :  { %368 = vsyncpa [#allocation10], 1 }
 0x294   :  { %369 = vsyncpa [#allocation13], 1 }
 0x295   :  { %370 = vsyncpa [#allocation5], 1 }

</bundles_post_ra>
